<compile_context>
chip_gen: v6e
topology: v6e:2x2x1
jax: 0.10.0
libtpu: 0.0.40
codegen_flags: <defaults>
</compile_context>

<pallas_src>
import functools

import jax
import jax.numpy as jnp
from jax.experimental import pallas as pl
from jax.experimental.pallas import tpu as pltpu


def _round_up(x, m):
    return (x + m - 1) // m * m


def _actor_critic_kernel(x_ref, w1_ref, w2_ref, bias_ref, out_ref, *, h2_pad, c_pad):
    x = x_ref[...]                                   # (TB, S)
    biases = bias_ref[...]                           # (8, P) packed bias slab
    b1 = biases[0:1, :h2_pad]                        # (1, H2_pad) = [b1c | b1a | 0]
    b2 = biases[1:2, :c_pad]                         # (1, C_pad)  = [b2c | b2a | 0]

    # Fused layer 1: hidden = [h_critic | h_actor | zero-pad]  (one MXU pass)
    h = jnp.dot(x, w1_ref[...], preferred_element_type=jnp.float32) + b1
    h = jnp.maximum(h, 0.0)                          # ReLU (pad cols stay 0)

    # Fused block-diagonal layer 2: out = [value | mu | zero-pad] (one MXU pass)
    out = jnp.dot(h, w2_ref[...], preferred_element_type=jnp.float32) + b2
    out_ref[...] = out.astype(out_ref.dtype)         # lane-dense (TB, C_pad) store


def pack_params(params):
    """Fuse + pad parameters once (offline) into MXU/DMA-friendly slabs."""
    w1c, w1a = params["w1c"], params["w1a"]
    b1c, b1a = params["b1c"], params["b1a"]
    w2c, w2a = params["w2c"], params["w2a"]
    b2c, b2a = params["b2c"], params["b2a"]

    S, F1 = w1c.shape
    A = w2a.shape[1]
    H2 = 2 * F1                      # fused hidden width
    C = 1 + A                        # [value | mu]
    H2_pad = _round_up(H2, 128)      # lane-dense hidden
    C_pad = _round_up(C, 128)        # lane-dense output
    P = max(H2_pad, C_pad)

    # Fused first-layer weight: (S, H2_pad) = [w1c | w1a | 0]
    w1 = jnp.zeros((S, H2_pad), jnp.float32)
    w1 = w1.at[:, :F1].set(w1c)
    w1 = w1.at[:, F1:H2].set(w1a)

    # Fused block-diagonal second-layer weight: (H2_pad, C_pad)
    #   rows 0:F1   x col 0        -> critic value
    #   rows F1:H2  x cols 1:1+A   -> actor mu
    w2 = jnp.zeros((H2_pad, C_pad), jnp.float32)
    w2 = w2.at[:F1, 0:1].set(w2c)
    w2 = w2.at[F1:H2, 1:1 + A].set(w2a)

    # All biases packed into a single (8, P) tile: row 0 = b1 fused, row 1 = b2 fused.
    bias = jnp.zeros((8, P), jnp.float32)
    bias = bias.at[0, :F1].set(b1c[0])
    bias = bias.at[0, F1:H2].set(b1a[0])
    bias = bias.at[1, 0].set(b2c[0, 0])
    bias = bias.at[1, 1:1 + A].set(b2a[0])

    return {
        "w1": w1, "w2": w2, "bias": bias,
        "log_std": params["log_std"],
        "meta": (S, F1, A, H2_pad, C_pad, P),
    }


def actor_critic_forward(x, packed, *, batch_tile=512):
    """Run the fused ActorCritic forward pass in a single Pallas TPU kernel.

    Args:
      x: (B, state_size) float32
      packed: output of pack_params(...)
    Returns:
      (mu, std, value) — mu/std: (B, A), value: (B, 1)
    """
    S, F1, A, H2_pad, C_pad, P = packed["meta"]
    B = x.shape[0]

    # Batch tile: >= 256 for real workloads; clamp to (8-aligned) batch for tiny demos.
    TB = min(batch_tile, _round_up(B, 8))
    B_pad = _round_up(B, TB)
    if B_pad != B:
        x = jnp.pad(x, ((0, B_pad - B), (0, 0)))
    grid = (B_pad // TB,)

    kernel = functools.partial(_actor_critic_kernel, h2_pad=H2_pad, c_pad=C_pad)

    out = pl.pallas_call(
        kernel,
        grid=grid,
        in_specs=[
            pl.BlockSpec((TB, S), lambda i: (i, 0)),          # x tiled over batch
            pl.BlockSpec((S, H2_pad), lambda i: (0, 0)),      # fused W1 (resident)
            pl.BlockSpec((H2_pad, C_pad), lambda i: (0, 0)),  # fused block-diag W2 (resident)
            pl.BlockSpec((8, P), lambda i: (0, 0)),           # packed bias slab (resident)
        ],
        out_specs=pl.BlockSpec((TB, C_pad), lambda i: (i, 0)),  # lane-dense combined output
        out_shape=jax.ShapeDtypeStruct((B_pad, C_pad), jnp.float32),
        compiler_params=pltpu.CompilerParams(
            dimension_semantics=("parallel",),                # shards batch across v7x's 2 TCs
        ),
    )(x, packed["w1"], packed["w2"], packed["bias"])

    value = out[:B, 0:1]
    mu = out[:B, 1:1 + A]
    # std = exp(log_std).expand_as(mu) — batch-independent, kept out of the kernel.
    std = jnp.broadcast_to(jnp.exp(packed["log_std"]), mu.shape)
    return mu, std, value


def init_params(key, state_size, fc1_dims, action_size, std=0.0):
    """Deterministic init mirroring ActorCritic.init_weights:
    weights ~ Normal(0, 0.1), biases = 0.1, log_std = std * ones.
    Linear weights stored transposed vs PyTorch: (in_features, out_features)."""
    k1, k2, k3, k4 = jax.random.split(key, 4)
    n = lambda k, shp: (0.1 * jax.random.normal(k, shp)).astype(jnp.float32)
    return {
        # critic: Linear(S, F1) -> ReLU -> Linear(F1, 1)
        "w1c": n(k1, (state_size, fc1_dims)),
        "b1c": jnp.full((1, fc1_dims), 0.1, jnp.float32),
        "w2c": n(k2, (fc1_dims, 1)),
        "b2c": jnp.full((1, 1), 0.1, jnp.float32),
        # actor: Linear(S, F1) -> ReLU -> Linear(F1, A)
        "w1a": n(k3, (state_size, fc1_dims)),
        "b1a": jnp.full((1, fc1_dims), 0.1, jnp.float32),
        "w2a": n(k4, (fc1_dims, action_size)),
        "b2a": jnp.full((1, action_size), 0.1, jnp.float32),
        # log_std parameter: ones(1, A) * std
        "log_std": jnp.full((1, action_size), std, jnp.float32),
    }


def _reference(x, p):
    """Pure-JAX reference (unfused) for correctness check."""
    h_c = jnp.maximum(x @ p["w1c"] + p["b1c"], 0.0)
    value = h_c @ p["w2c"] + p["b2c"]
    h_a = jnp.maximum(x @ p["w1a"] + p["b1a"], 0.0)
    mu = h_a @ p["w2a"] + p["b2a"]
    std = jnp.broadcast_to(jnp.exp(p["log_std"]), mu.shape)
    return mu, std, value


if __name__ == "__main__":
    # Small shapes consistent with the module: (B, state_size) input.
    B, STATE, FC1, ACTION = 8, 16, 32, 4

    key = jax.random.PRNGKey(0)
    kx, kp = jax.random.split(key)
    x = jax.random.normal(kx, (B, STATE), dtype=jnp.float32)
    params = init_params(kp, STATE, FC1, ACTION, std=0.0)
    packed = pack_params(params)

    mu, std, value = actor_critic_forward(x, packed)
    jax.block_until_ready((mu, std, value))

    mu_r, std_r, value_r = _reference(x, params)
    assert mu.shape == (B, ACTION) and std.shape == (B, ACTION) and value.shape == (B, 1)
    assert jnp.allclose(mu, mu_r, atol=1e-4), "mu mismatch"
    assert jnp.allclose(std, std_r, atol=1e-5), "std mismatch"
    assert jnp.allclose(value, value_r, atol=1e-4), "value mismatch"

    print("KERNEL_OK")
</pallas_src>

<mosaic_0001>
module attributes {stable_mosaic.version = 11 : i64} {
  func.func @_actor_critic_kernel(%arg0: i32, %arg1: memref<8x16xf32, #tpu.memory_space<vmem>>, %arg2: memref<16x128xf32, #tpu.memory_space<vmem>>, %arg3: memref<128x128xf32, #tpu.memory_space<vmem>>, %arg4: memref<8x128xf32, #tpu.memory_space<vmem>>, %arg5: memref<8x128xf32, #tpu.memory_space<vmem>>) attributes {dimension_semantics = [#tpu.dimension_semantics<parallel>], iteration_bounds = array<i64: 1>, scalar_prefetch = 0 : i64, scratch_operands = 0 : i64, tpu.core_type = #tpu.core_type<tc>, window_params = [{transform_indices = @transform_0, window_bounds = array<i64: 8, 16>}, {pipeline_mode = #tpu.pipeline_mode<synchronous>, transform_indices = @transform_1, window_bounds = array<i64: 16, 128>}, {pipeline_mode = #tpu.pipeline_mode<synchronous>, transform_indices = @transform_2, window_bounds = array<i64: 128, 128>}, {pipeline_mode = #tpu.pipeline_mode<synchronous>, transform_indices = @transform_3, window_bounds = array<i64: 8, 128>}, {transform_indices = @transform_4, window_bounds = array<i64: 8, 128>}]} {
    %c0 = arith.constant 0 : index
    %c0_0 = arith.constant 0 : index
    %0 = vector.load %arg1[%c0, %c0_0] : memref<8x16xf32, #tpu.memory_space<vmem>>, vector<8x16xf32>
    %c0_1 = arith.constant 0 : index
    %c0_2 = arith.constant 0 : index
    %1 = vector.load %arg4[%c0_1, %c0_2] : memref<8x128xf32, #tpu.memory_space<vmem>>, vector<8x128xf32>
    %2 = vector.extract_strided_slice %1 {offsets = [0, 0], sizes = [1, 128], strides = [1, 1]} : vector<8x128xf32> to vector<1x128xf32>
    %3 = vector.extract_strided_slice %1 {offsets = [1, 0], sizes = [1, 128], strides = [1, 1]} : vector<8x128xf32> to vector<1x128xf32>
    %c0_3 = arith.constant 0 : index
    %c0_4 = arith.constant 0 : index
    %4 = vector.load %arg2[%c0_3, %c0_4] : memref<16x128xf32, #tpu.memory_space<vmem>>, vector<16x128xf32>
    %cst = arith.constant dense<0.000000e+00> : vector<8x128xf32>
    %5 = tpu.matmul %0, %4, %cst {dimension_numbers = #tpu.dot_dimension_numbers<[1], [0], [0], [1], [0, 0, 1, 1], [], []>} : vector<8x16xf32>, vector<16x128xf32>, vector<8x128xf32> -> vector<8x128xf32>
    %6 = vector.broadcast %2 : vector<1x128xf32> to vector<8x128xf32>
    %7 = arith.addf %5, %6 : vector<8x128xf32>
    %cst_5 = arith.constant 0.000000e+00 : f32
    %8 = vector.broadcast %cst_5 : f32 to vector<8x128xf32>
    %9 = arith.maximumf %7, %8 : vector<8x128xf32>
    %c0_6 = arith.constant 0 : index
    %c0_7 = arith.constant 0 : index
    %10 = vector.load %arg3[%c0_6, %c0_7] : memref<128x128xf32, #tpu.memory_space<vmem>>, vector<128x128xf32>
    %cst_8 = arith.constant dense<0.000000e+00> : vector<8x128xf32>
    %11 = tpu.matmul %9, %10, %cst_8 {dimension_numbers = #tpu.dot_dimension_numbers<[1], [0], [0], [1], [0, 0, 1, 1], [], []>} : vector<8x128xf32>, vector<128x128xf32>, vector<8x128xf32> -> vector<8x128xf32>
    %12 = vector.broadcast %3 : vector<1x128xf32> to vector<8x128xf32>
    %13 = arith.addf %11, %12 : vector<8x128xf32>
    %c0_9 = arith.constant 0 : index
    %c0_10 = arith.constant 0 : index
    %14 = vector.load %arg5[%c0_9, %c0_10] : memref<8x128xf32, #tpu.memory_space<vmem>>, vector<8x128xf32>
    tpu.vector_store %arg5[%c0_9, %c0_10], %13 {strides = array<i32>} : memref<8x128xf32, #tpu.memory_space<vmem>>, vector<8x128xf32>,
    return
  }
  func.func @transform_0(%arg0: i32) -> (i32, i32) {
    %c0_i32 = arith.constant 0 : i32
    %c0_i32_0 = arith.constant 0 : i32
    return %arg0, %c0_i32 : i32, i32
  }
  func.func @transform_1(%arg0: i32) -> (i32, i32) {
    %c0_i32 = arith.constant 0 : i32
    %c0_i32_0 = arith.constant 0 : i32
    %c0_i32_1 = arith.constant 0 : i32
    return %c0_i32, %c0_i32_0 : i32, i32
  }
  func.func @transform_2(%arg0: i32) -> (i32, i32) {
    %c0_i32 = arith.constant 0 : i32
    %c0_i32_0 = arith.constant 0 : i32
    %c0_i32_1 = arith.constant 0 : i32
    return %c0_i32, %c0_i32_0 : i32, i32
  }
  func.func @transform_3(%arg0: i32) -> (i32, i32) {
    %c0_i32 = arith.constant 0 : i32
    %c0_i32_0 = arith.constant 0 : i32
    %c0_i32_1 = arith.constant 0 : i32
    return %c0_i32, %c0_i32_0 : i32, i32
  }
  func.func @transform_4(%arg0: i32) -> (i32, i32) {
    %c0_i32 = arith.constant 0 : i32
    %c0_i32_0 = arith.constant 0 : i32
    return %arg0, %c0_i32 : i32, i32
  }
}

</mosaic_0001>

<bundles_post_ra>
// kernel: tpu_custom_call.1
= control target key start
LH: loop header
LB: loop body
LE: loop exit
PB: predicated region body
PF: predicated region fallthrough
CT: control target
= control target key end

     0   :  { %9 = vsyncpa [#allocation3], 0  ;;  %s489_s0 = inlined_call_operand.hbm [shape: f32[8,16], index: 0, kind: input, shape index: {}]   ;;  %s490_s1 = inlined_call_operand.hbm [shape: f32[16,128], index: 1, kind: input, shape index: {}]   ;;  %s491_s2 = inlined_call_operand.hbm [shape: f32[128,128], index: 2, kind: input, shape index: {}]   ;;  %s492_s3 = inlined_call_operand.hbm [shape: f32[8,128], index: 3, kind: input, shape index: {}]   ;;  %s493_s4 = inlined_call_operand.hbm [shape: f32[8,128], index: 4, kind: output, shape index: {}]  }
   0x1   :  { %10 = vsyncpa [#allocation6], 0 }
   0x2   :  { %11 = vsyncpa [#allocation9], 0 }
   0x3   :  { %12 = vsyncpa [#allocation4], 0  ;;  %s440_s15 = smov [#allocation5]  }
   0x4   :  { %s28_s16 = sshll.u32 %s440_s15, 4  ;;  %s29_s16 = int_to_ptr.vmem [resolvable:$true] %s28_s16 }
   0x5   :  { %s340_s17 = scalar_lea.vmem %s29_s16, 256  ;;  %p345_p1 = scmp.lt.s32.totalorder %s29_s16, %s29_s16 }
   0x6   :  { %p341_p0 = scmp.ne.s32.totalorder %s29_s16, %s340_s17  ;;  %p346_p2 = scmp.lt.s32.totalorder %s340_s17, %s340_s17 }
   0x8   :  { %p347_p3 = por %p346_p2, %p345_p1 }
   0xa   :  { %p348_p4 = pnand %p347_p3, %p341_p0 }
   0xc   :  { %351 = shalt.err (!%p348_p4)
}
   0xd   :  { %s441_s18 = smov 128   ;;  %s442_s19 = smov 8  }
   0xe   :  { %34 = dma.hbm_to_vmem [thread:$0]  %s490_s1, 256, %s29_s16, [#allocation6], %s441_s18, %s441_s18, %s442_s19  }
   0xf   :  { %s443_s22 = smov [#allocation2]   ;;  %s444_s24 = smov [#allocation7]  }
  0x10   :  { %s19_s23 = sshll.u32 %s443_s22, 4  ;;  %s40_s25 = sshll.u32 %s444_s24, 4  ;;  %s20_s23 = int_to_ptr.vmem [resolvable:$true] %s19_s23  ;;  %s41_s25 = int_to_ptr.vmem [resolvable:$true] %s40_s25 }
  0x11   :  { %s360_s26 = scalar_lea.vmem %s20_s23, 128  ;;  %p365_p6 = scmp.lt.s32.totalorder %s20_s23, %s20_s23 }
  0x12   :  { %p361_p5 = scmp.ne.s32.totalorder %s20_s23, %s360_s26  ;;  %p366_p7 = scmp.lt.s32.totalorder %s360_s26, %s360_s26 }
  0x14   :  { %p367_p8 = por %p366_p7, %p365_p6 }
  0x16   :  { %p368_p9 = pnand %p367_p8, %p361_p5 }
  0x18   :  { %371 = shalt.err (!%p368_p9)
}
  0x19   :  { %22 = dma.hbm_to_vmem [thread:$0]  %s489_s0, 128, %s20_s23, [#allocation3]  }
  0x1a   :  { %s380_s29 = scalar_lea.vmem %s41_s25, 2048  ;;  %p385_p11 = scmp.lt.s32.totalorder %s41_s25, %s41_s25 }
  0x1b   :  { %p381_p10 = scmp.ne.s32.totalorder %s41_s25, %s380_s29  ;;  %p386_p12 = scmp.lt.s32.totalorder %s380_s29, %s380_s29 }
  0x1d   :  { %p387_p13 = por %p386_p12, %p385_p11 }
  0x1f   :  { %p388_p0 = pnand %p387_p13, %p381_p10 }
  0x21   :  { %391 = shalt.err (!%p388_p0)
}
  0x22   :  { %46 = dma.hbm_to_vmem [thread:$0]  %s491_s2, 2048, %s41_s25, [#allocation6], %s441_s18, %s441_s18, %s442_s19  }
  0x23   :  { %s445_s5 = smov [#allocation8]  }
  0x24   :  { %s53_s6 = sshll.u32 %s445_s5, 4  ;;  %s54_s6 = int_to_ptr.vmem [resolvable:$true] %s53_s6 }
  0x25   :  { %s400_s7 = scalar_lea.vmem %s54_s6, 128  ;;  %p405_p2 = scmp.lt.s32.totalorder %s54_s6, %s54_s6 }
  0x26   :  { %p401_p1 = scmp.ne.s32.totalorder %s54_s6, %s400_s7  ;;  %p406_p3 = scmp.lt.s32.totalorder %s400_s7, %s400_s7 }
  0x28   :  { %p407_p4 = por %p406_p3, %p405_p2 }
  0x2a   :  { %p408_p5 = pnand %p407_p4, %p401_p1 }
  0x2c   :  { %411 = shalt.err (!%p408_p5)
}
  0x2d   :  { %56 = dma.hbm_to_vmem [thread:$0]  %s492_s3, 128, %s54_s6, [#allocation9]  }
  0x2e   :  { %432 = dma.done.wait [#allocation3], 128  }
  0x2f   :  { %433 = vsyncadd [#allocation3], 4294967168 }
  0x30   :  { %434 = dma.done.wait [#allocation6], 2304  }
  0x31   :  { %435 = vsyncadd [#allocation6], 4294964992 }
  0x32   :  { %436 = dma.done.wait [#allocation9], 128  }
  0x33   :  { %437 = vsyncadd [#allocation9], 4294967168  ;;  %v446_v0 = vmov 0.0   ;;  %vm447_vm0 = vmmov 0   ;;  %v72_v1 = vld [vmem:[#allocation5 + $0x8] sm:$0xff]  ;;  %v71_v2 = vld [vmem:[#allocation5] sm:$0xff]  ;;  %v73_v20 = vlaneseq }
  0x34   :  { %281 = vmatprep.subr.mxu0 %v446_v0  ;;  %285 = vmatprep.mubr.msk.f32.mxu0 %vm447_vm0, %v446_v0  ;;  %v69_v3 = vld [vmem:[#allocation2] sm:$0xff]  ;;  %vm77_vm1 = vcmask 130048   ;;  %v167_v4 = vld [vmem:[#allocation7 + $0x78] sm:$0xff]  ;;  %v166_v5 = vld [vmem:[#allocation7 + $0x70] sm:$0xff]  ;;  %s448_s2 = smov [#allocation10]  }
  0x35   :  { %288 = vmatprep.subr.mxu1 %v446_v0  ;;  %320 = vmatprep.mubr.msk.f32.mxu1 %vm447_vm0, %v446_v0  ;;  %v165_v6 = vld [vmem:[#allocation7 + $0x68] sm:$0xff]  ;;  %v164_v7 = vld [vmem:[#allocation7 + $0x60] sm:$0xff]  ;;  %v163_v8 = vld [vmem:[#allocation7 + $0x58] sm:$0xff]  ;;  %v74_v21 = vshrl.u32 %v73_v20, 7  ;;  %s249_s3 = sshll.u32 %s448_s2, 4  ;;  %s250_s3 = int_to_ptr.vmem [resolvable:$true] %s249_s3 }
  0x36   :  { %282 = vmatpush3.msra.mxu0 %v72_v1  ;;  %289 = vmatpush3.msra.mxu1 %v167_v4  ;;  %v162_v9 = vld [vmem:[#allocation7 + $0x50] sm:$0xff]  ;;  %v161_v10 = vld [vmem:[#allocation7 + $0x48] sm:$0xff]  ;;  %v160_v11 = vld [vmem:[#allocation7 + $0x40] sm:$0xff]  ;;  %s412_s9 = scalar_lea.vmem %s250_s3, 128  ;;  %p417_p7 = scmp.lt.s32.totalorder %s250_s3, %s250_s3 }
  0x37   :  { %283 = vmatprep.subr.mxu0 %v446_v0  ;;  %290 = vmatprep.subr.mxu1 %v446_v0  ;;  %v159_v12 = vld [vmem:[#allocation7 + $0x38] sm:$0xff]  ;;  %v158_v13 = vld [vmem:[#allocation7 + $0x30] sm:$0xff]  ;;  %v157_v14 = vld [vmem:[#allocation7 + $0x28] sm:$0xff]  ;;  %v75_v22 = vsub.s32 0, %v74_v21  ;;  %v170_v29 = vsub.s32 1, %v74_v21  ;;  %p413_p6 = scmp.ne.s32.totalorder %s250_s3, %s412_s9  ;;  %p418_p8 = scmp.lt.s32.totalorder %s412_s9, %s412_s9 }
  0x38   :  { %284 = vmatpush3.msra.mxu0 %v71_v2  ;;  %291 = vmatpush3.msra.mxu1 %v166_v5  ;;  %v156_v15 = vld [vmem:[#allocation7 + $0x20] sm:$0xff]  ;;  %v155_v16 = vld [vmem:[#allocation7 + $0x18] sm:$0xff]  ;;  %v154_v17 = vld [vmem:[#allocation7 + $0x10] sm:$0xff] }
  0x39   :  { %286 = vmatmul.mubr.msk.f32.vlgmr.msra.gmra.mxu0 %vm77_vm1, %v69_v3  ;;  %292 = vmatprep.subr.mxu1 %v446_v0  ;;  %v153_v18 = vld [vmem:[#allocation7 + $0x8] sm:$0xff]  ;;  %v152_v19 = vld [vmem:[#allocation7] sm:$0xff]  ;;  %p419_p9 = por %p418_p8, %p417_p7 }
  0x3a   :  { %293 = vmatpush3.msra.mxu1 %v165_v6  ;;  %v70_v23 = vld [vmem:[#allocation8] sm:$0xff] }
  0x3b   :  { %294 = vmatprep.subr.mxu1 %v446_v0  ;;  %v76_v24 = vrot.slane %v70_v23, %v75_v22  ;;  %v171_v30 = vrot.slane %v70_v23, %v170_v29  ;;  %p420_p10 = pnand %p419_p9, %p413_p6 }
  0x3c   :  { %295 = vmatpush3.msra.mxu1 %v164_v7 }
  0x3d   :  { %296 = vmatprep.subr.mxu1 %v446_v0 }
  0x3e   :  { %297 = vmatpush3.msra.mxu1 %v163_v8 }
  0x3f   :  { %298 = vmatprep.subr.mxu1 %v446_v0 }
  0x40   :  { %299 = vmatpush3.msra.mxu1 %v162_v9 }
  0x41   :  { %300 = vmatprep.subr.mxu1 %v446_v0 }
  0x42   :  { %301 = vmatpush3.msra.mxu1 %v161_v10 }
  0x43   :  { %302 = vmatprep.subr.mxu1 %v446_v0 }
  0x44   :  { %303 = vmatpush3.msra.mxu1 %v160_v11 }
  0x45   :  { %304 = vmatprep.subr.mxu1 %v446_v0 }
  0x46   :  { %305 = vmatpush3.msra.mxu1 %v159_v12 }
  0x47   :  { %306 = vmatprep.subr.mxu1 %v446_v0 }
  0x48   :  { %307 = vmatpush3.msra.mxu1 %v158_v13 }
  0x49   :  { %308 = vmatprep.subr.mxu1 %v446_v0 }
  0x4a   :  { %309 = vmatpush3.msra.mxu1 %v157_v14 }
  0x4b   :  { %310 = vmatprep.subr.mxu1 %v446_v0 }
  0x4c   :  { %311 = vmatpush3.msra.mxu1 %v156_v15 }
  0x4d   :  { %312 = vmatprep.subr.mxu1 %v446_v0 }
  0x4e   :  { %313 = vmatpush3.msra.mxu1 %v155_v16 }
  0x4f   :  { %314 = vmatprep.subr.mxu1 %v446_v0 }
  0x50   :  { %315 = vmatpush3.msra.mxu1 %v154_v17 }
  0x51   :  { %316 = vmatprep.subr.mxu1 %v446_v0 }
  0x52   :  { %317 = vmatpush3.msra.mxu1 %v153_v18 }
  0x53   :  { %318 = vmatprep.subr.mxu1 %v446_v0 }
  0x54   :  { %319 = vmatpush3.msra.mxu1 %v152_v19 }
  0xf9   :  { %v147_v25 = vpop.f32.mrf.mxu0 }
  0xfa   :  { %v148_v26 = vadd.f32 %v147_v25, %v76_v24 }
  0xfb   :  { %v287_v27 = vpop.f32.mrf.mxu0 }
  0xfc   :  { %v151_v28 = vmax.f32 %v148_v26, 0.0 }
  0xfe   :  { %321 = vmatmul.mubr.f32.vlgmr.msra.gmra.mxu1 %v151_v28 }
 0x1be   :  { %v238_v31 = vpop.f32.mrf.mxu1 }
 0x1bf   :  { %v239_v32 = vadd.f32 %v238_v31, %v171_v30 }
 0x1c0   :  { %v322_v33 = vpop.f32.mrf.mxu1 }
 0x1c1   :  { %242 = vst [vmem:[#allocation10] sm:$0xff] %v239_v32 }
 0x1c2   :  { %423 = shalt.err (!%p420_p10)
}
 0x1c3   :  { %252 = dma.vmem_to_hbm [thread:$0]  %s250_s3, 128, %s493_s4, [#allocation4]  }
 0x1c4   :  { %438 = dma.done.wait [#allocation4], 128  }
 0x1c5   :  { %439 = vsyncadd [#allocation4], 4294967168 }
 0x1c6   :  { %256 = vsyncpa [#allocation3], 1 }
 0x1c7   :  { %257 = vsyncpa [#allocation6], 1 }
 0x1c8   :  { %258 = vsyncpa [#allocation9], 1 }
 0x1c9   :  { %259 = vsyncpa [#allocation4], 1 }

</bundles_post_ra>
